<compile_context>
chip_gen: v7x
topology: tpu7x:2x2x1
jax: 0.10.0
libtpu: 0.0.40
codegen_flags: <defaults>
</compile_context>

<pallas_src>
import functools

import jax
import jax.numpy as jnp
from jax.experimental import pallas as pl
from jax.experimental.pallas import tpu as pltpu


def _round_up(x, m):
    return (x + m - 1) // m * m


def _judge_kernel(yes_ref, h_ref, w_ref, *out_and_scratch,
                  n_yes, tile_v, tiles_per_split, vocab_size, vocab_padded,
                  emit_logits):
    """Per-(split, vocab-tile) kernel: LM-head matmul + running yes/non maxes.

    yes_ref:   (n_yes,)     int32 SMEM  yes-token vocab ids (scalar prefetch)
    h_ref:     (Bp, D)      bf16  VMEM  last-token hidden states (resident)
    w_ref:     (D, TILE_V)  bf16  VMEM  LM-head weight tile (streamed)
    outputs:   [logits (Bp, TILE_V) f32]  (only if emit_logits)
               p_yes (1, Bp, 1) f32   per-split max over yes-token logits
               p_non (1, Bp, 1) f32   per-split max over non-yes logits
    scratch:   two (Bp, 1) f32 running maxes
    """
    if emit_logits:
        logits_ref, pyes_ref, pnon_ref, max_yes_sc, max_non_sc = out_and_scratch
    else:
        pyes_ref, pnon_ref, max_yes_sc, max_non_sc = out_and_scratch
        logits_ref = None

    c = pl.program_id(0)          # vocab split ("parallel": shards across TCs)
    v = pl.program_id(1)          # vocab tile within split (reduction axis)

    @pl.when(v == 0)
    def _():
        max_yes_sc[...] = jnp.full_like(max_yes_sc, -jnp.inf)
        max_non_sc[...] = jnp.full_like(max_non_sc, -jnp.inf)

    # MXU: bf16 x bf16 with f32 accumulation (no operand pre-cast).
    logits = jnp.dot(h_ref[...], w_ref[...], preferred_element_type=jnp.float32)
    if emit_logits:
        logits_ref[...] = logits                       # lane-dense f32 store

    # Vocab ids covered by this tile; tiny yes-mask built from SMEM ids.
    tile_ids = ((c * tiles_per_split + v) * tile_v
                + jax.lax.broadcasted_iota(jnp.int32, (1, tile_v), 1))
    yes_mask = tile_ids == yes_ref[0]
    for i in range(1, n_yes):                          # n_yes ~ 4-5, static unroll
        yes_mask = yes_mask | (tile_ids == yes_ref[i])

    neg_inf = jnp.float32(-jnp.inf)
    # yes ids are guaranteed < vocab_size (wrapper check), so no padding mask here.
    tile_yes = jnp.max(jnp.where(yes_mask, logits, neg_inf), axis=-1, keepdims=True)
    if vocab_padded:
        non_mask = (~yes_mask) & (tile_ids < vocab_size)
    else:
        non_mask = ~yes_mask
    tile_non = jnp.max(jnp.where(non_mask, logits, neg_inf), axis=-1, keepdims=True)

    max_yes_sc[...] = jnp.maximum(max_yes_sc[...], tile_yes)
    max_non_sc[...] = jnp.maximum(max_non_sc[...], tile_non)

    @pl.when(v == pl.num_programs(1) - 1)
    def _():
        pyes_ref[0] = max_yes_sc[...]
        pnon_ref[0] = max_non_sc[...]


def judge_forward(hidden, attention_mask, lm_head_w, yes_tokens, *,
                  tile_v=2048, num_vocab_splits=2, w_buffers=2,
                  return_logits=False):
    """JAX wrapper reproducing Judge.forward numerics (right padding path).

    hidden:         (B, S, D) bf16   transformer last hidden states
    attention_mask: (B, S)    int32  1 = real token, 0 = pad (right padded)
    lm_head_w:      (D, V)    bf16   LM head weight (x @ W -> logits)
    yes_tokens:     (n_yes,)  int32  vocab ids of "yes"-class tokens

    tile_v:           vocab tile width (multiple of 128). 2048 amortizes grid
                      overhead and keeps the double-buffered W stream under
                      v7x's 64 MiB VMEM at D~4k; v5e/v6e (128 MiB) can use
                      4096 or w_buffers=3 for deeper pipelining.
    num_vocab_splits: leading "parallel" vocab axis (shards the W stream
                      across both TensorCores on v7x; no-op elsewhere).
    return_logits:    if False, skip the dense (B, V) f32 logits writeback.

    returns: reward (B,) f32  [, logits (B, V) f32 if return_logits]
    """
    B, S, D = hidden.shape
    V = lm_head_w.shape[1]
    n_yes = int(yes_tokens.shape[0])
    assert n_yes > 0, "yes_tokens must be non-empty"
    assert tile_v % 128 == 0, "tile_v must be a multiple of 128"

    # Guard against out-of-range yes ids (-inf/NaN reward); skipped under jit.
    try:
        ids_host = jax.device_get(yes_tokens)
    except Exception:
        ids_host = None
    if ids_host is not None:
        assert int(ids_host.min()) >= 0 and int(ids_host.max()) < V, \
            "yes_tokens must be valid vocab ids (< V)"

    # --- glue (plain JAX): locate last non-padded token, gather its hidden ---
    target_pos = jnp.max(jnp.cumsum(attention_mask, axis=-1) - 1, axis=-1)     # (B,)
    target_pos = jnp.clip(target_pos, 0, S - 1)
    h_last = jnp.take_along_axis(hidden, target_pos[:, None, None], axis=1)[:, 0, :]
    h_last = h_last.astype(jnp.bfloat16)

    # Pad batch to a full sublane group; extra rows are ~free (W stream dominates).
    Bp = max(8, _round_up(B, 8))
    if Bp != B:
        h_last = jnp.pad(h_last, ((0, Bp - B), (0, 0)))

    # Don't over-size the tile at tiny vocabs; clamp splits to available tiles.
    tile_v = min(tile_v, _round_up(V, 128))
    num_vocab_splits = max(1, min(num_vocab_splits, _round_up(V, 128) // tile_v))

    # Pad vocab to a multiple of tile_v * num_vocab_splits (lane-dense tiles).
    chunk = tile_v * num_vocab_splits
    Vp = _round_up(V, chunk)
    w = lm_head_w if Vp == V else jnp.pad(lm_head_w, ((0, 0), (0, Vp - V)))
    n_tiles = Vp // tile_v
    tiles_per_split = n_tiles // num_vocab_splits

    # VMEM budget: W stream buffers dominate; stay within v7x's 64 MiB at
    # defaults, more headroom is used automatically on v5e/v6e if requested.
    w_bytes = D * tile_v * 2 * max(2, w_buffers)
    h_bytes = Bp * D * 2 * 2
    lg_bytes = (Bp * tile_v * 4 * 2) if return_logits else 0
    vmem_limit = int(min(max(1.3 * (w_bytes + h_bytes + lg_bytes) + (2 << 20),
                             32 << 20), 110 << 20))

    w_spec_kwargs = {}
    if w_buffers != 2:
        w_spec_kwargs["pipeline_mode"] = pl.Buffered(w_buffers)
    w_spec = pl.BlockSpec(
        (D, tile_v), lambda c, v, yes: (0, c * tiles_per_split + v),
        **w_spec_kwargs)

    out_shapes = []
    out_specs = []
    if return_logits:
        out_shapes.append(jax.ShapeDtypeStruct((Bp, Vp), jnp.float32))
        out_specs.append(pl.BlockSpec(
            (Bp, tile_v), lambda c, v, yes: (0, c * tiles_per_split + v)))
    out_shapes += [jax.ShapeDtypeStruct((num_vocab_splits, Bp, 1), jnp.float32)] * 2
    out_specs += [pl.BlockSpec((1, Bp, 1), lambda c, v, yes: (c, 0, 0))] * 2

    kernel = functools.partial(
        _judge_kernel, n_yes=n_yes, tile_v=tile_v,
        tiles_per_split=tiles_per_split, vocab_size=V,
        vocab_padded=(Vp != V), emit_logits=return_logits)

    outs = pl.pallas_call(
        kernel,
        out_shape=tuple(out_shapes),
        grid_spec=pltpu.PrefetchScalarGridSpec(
            num_scalar_prefetch=1,                    # yes_tokens -> SMEM
            grid=(num_vocab_splits, tiles_per_split),
            in_specs=[
                pl.BlockSpec((Bp, D), lambda c, v, yes: (0, 0)),   # h_last (resident)
                w_spec,                                            # W tile stream
            ],
            out_specs=tuple(out_specs),
            scratch_shapes=[
                pltpu.VMEM((Bp, 1), jnp.float32),   # running max over yes logits
                pltpu.VMEM((Bp, 1), jnp.float32),   # running max over non-yes logits
            ],
        ),
        compiler_params=pltpu.CompilerParams(
            # leading split axis: shards the W stream across v7x's two TCs;
            # inner vocab axis carries the running-max scratch -> "arbitrary".
            dimension_semantics=("parallel", "arbitrary"),
            vmem_limit_bytes=vmem_limit,
        ),
    )(yes_tokens.astype(jnp.int32), h_last, w)

    if return_logits:
        logits, p_yes, p_non = outs
    else:
        p_yes, p_non = outs

    # Tiny cross-split reduce + sigmoid in the wrapper (log_softmax's LSE
    # cancels in the lift, so reward = sigmoid(max_yes - max_non)).
    max_yes = jnp.max(p_yes[:, :B, 0], axis=0)
    max_non = jnp.max(p_non[:, :B, 0], axis=0)
    reward = jax.nn.sigmoid(max_yes - max_non)

    if return_logits:
        return reward, logits[:B, :V]
    return reward


def _reference(hidden, attention_mask, lm_head_w, yes_tokens):
    """Pure-JAX reference mirroring the PyTorch code path."""
    B, S, D = hidden.shape
    target_pos = jnp.max(jnp.cumsum(attention_mask, axis=-1) - 1, axis=-1)
    h_last = jnp.take_along_axis(hidden, target_pos[:, None, None], axis=1)[:, 0, :]
    logits = jnp.dot(h_last.astype(jnp.float32), lm_head_w.astype(jnp.float32))
    # sigmoid_yes_odds
    yes_logits = logits[:, yes_tokens]                                   # (B, n_yes)
    most_likely_yes = yes_tokens[jnp.argmax(yes_logits, axis=-1)]        # (B,)
    masked = logits.at[:, yes_tokens].set(-jnp.inf)
    most_likely_non_yes = jnp.argmax(masked, axis=-1)                    # (B,)
    logp = jax.nn.log_softmax(logits, axis=-1)
    lift = (jnp.take_along_axis(logp, most_likely_yes[:, None], axis=1)
            - jnp.take_along_axis(logp, most_likely_non_yes[:, None], axis=1))[:, 0]
    return jax.nn.sigmoid(lift), logits


if __name__ == "__main__":
    # Small synthetic shapes consistent with the module's forward:
    # batch=2, seq=8, hidden=32, vocab=500 (non-128-aligned -> exercises the
    # vocab-padding mask), 4 "yes" tokens (cf. HarmBench classifiers).
    B, S, D, V = 2, 8, 32, 500

    key = jax.random.PRNGKey(0)
    k_h, k_w = jax.random.split(key)

    hidden = jax.random.normal(k_h, (B, S, D), dtype=jnp.float32).astype(jnp.bfloat16)
    lm_head_w = (0.05 * jax.random.normal(k_w, (D, V), dtype=jnp.float32)).astype(jnp.bfloat16)

    # right padding: row 0 has 8 real tokens, row 1 has 5 real tokens + 3 pads
    attention_mask = jnp.array(
        [[1, 1, 1, 1, 1, 1, 1, 1],
         [1, 1, 1, 1, 1, 0, 0, 0]], dtype=jnp.int32)

    # analogue of self.yes_tokens (4 vocab ids), as in the HarmBench judges
    yes_tokens = jnp.array([7, 41, 123, 400], dtype=jnp.int32)

    # Full path: tile_v=128 & 2 splits -> 2x2 grid, exercises accumulation,
    # the cross-split reduce and the padded-vocab mask.
    reward, logits = judge_forward(hidden, attention_mask, lm_head_w, yes_tokens,
                                   tile_v=128, num_vocab_splits=2,
                                   return_logits=True)
    jax.block_until_ready(reward)

    # Reward-only path (no dense logits writeback).
    reward_only = judge_forward(hidden, attention_mask, lm_head_w, yes_tokens,
                                tile_v=128, num_vocab_splits=2,
                                return_logits=False)
    jax.block_until_ready(reward_only)

    ref_reward, ref_logits = _reference(hidden, attention_mask, lm_head_w, yes_tokens)

    assert reward.shape == (B,) and reward.dtype == jnp.float32
    assert logits.shape == (B, V) and logits.dtype == jnp.float32
    assert bool(jnp.all(jnp.isfinite(reward)))
    assert bool(jnp.allclose(logits, ref_logits, atol=1e-2, rtol=1e-2))
    assert bool(jnp.allclose(reward, ref_reward, atol=2e-3, rtol=2e-3))
    assert bool(jnp.allclose(reward, reward_only, atol=1e-6, rtol=1e-6))

    print("KERNEL_OK")
</pallas_src>

<mosaic_0001>
module attributes {stable_mosaic.version = 11 : i64} {
  func.func @_judge_kernel(%arg0: i32, %arg1: i32, %arg2: memref<4xi32, #tpu.memory_space<smem>>, %arg3: memref<8x32xbf16, #tpu.memory_space<vmem>>, %arg4: memref<32x128xbf16, #tpu.memory_space<vmem>>, %arg5: memref<8x128xf32, #tpu.memory_space<vmem>>, %arg6: memref<1x8x1xf32, #tpu.memory_space<vmem>>, %arg7: memref<1x8x1xf32, #tpu.memory_space<vmem>>, %arg8: memref<8x1xf32, #tpu.memory_space<vmem>>, %arg9: memref<8x1xf32, #tpu.memory_space<vmem>>) attributes {dimension_semantics = [#tpu.dimension_semantics<parallel>, #tpu.dimension_semantics<arbitrary>], iteration_bounds = array<i64: 2, 2>, scalar_prefetch = 1 : i64, scratch_operands = 2 : i64, tpu.core_type = #tpu.core_type<tc>, window_params = [{pipeline_mode = #tpu.pipeline_mode<synchronous>, transform_indices = @transform_0, window_bounds = array<i64: 8, 32>}, {transform_indices = @transform_1, window_bounds = array<i64: 32, 128>}, {transform_indices = @transform_2, window_bounds = array<i64: 8, 128>}, {transform_indices = @transform_3, window_bounds = array<i64: 1, 8, 1>}, {transform_indices = @transform_4, window_bounds = array<i64: 1, 8, 1>}]} {
    %c0_i32 = arith.constant 0 : i32
    %0 = arith.cmpi eq, %arg1, %c0_i32 : i32
    %1 = arith.extui %0 : i1 to i32
    %c0_i32_0 = arith.constant 0 : i32
    %2 = arith.cmpi ne, %1, %c0_i32_0 : i32
    scf.if %2 {
      %cst_21 = arith.constant 0xFF800000 : f32
      %53 = vector.broadcast %cst_21 : f32 to vector<8x1xf32>
      %c0_22 = arith.constant 0 : index
      %c0_23 = arith.constant 0 : index
      %54 = vector.load %arg8[%c0_22, %c0_23] : memref<8x1xf32, #tpu.memory_space<vmem>>, vector<8x1xf32>
      tpu.vector_store %arg8[%c0_22, %c0_23], %53 {strides = array<i32>} : memref<8x1xf32, #tpu.memory_space<vmem>>, vector<8x1xf32>,
      %cst_24 = arith.constant 0xFF800000 : f32
      %55 = vector.broadcast %cst_24 : f32 to vector<8x1xf32>
      %c0_25 = arith.constant 0 : index
      %c0_26 = arith.constant 0 : index
      %56 = vector.load %arg9[%c0_25, %c0_26] : memref<8x1xf32, #tpu.memory_space<vmem>>, vector<8x1xf32>
      tpu.vector_store %arg9[%c0_25, %c0_26], %55 {strides = array<i32>} : memref<8x1xf32, #tpu.memory_space<vmem>>, vector<8x1xf32>,
    } else {
    }
    %c0 = arith.constant 0 : index
    %c0_1 = arith.constant 0 : index
    %3 = vector.load %arg3[%c0, %c0_1] : memref<8x32xbf16, #tpu.memory_space<vmem>>, vector<8x32xbf16>
    %c0_2 = arith.constant 0 : index
    %c0_3 = arith.constant 0 : index
    %4 = vector.load %arg4[%c0_2, %c0_3] : memref<32x128xbf16, #tpu.memory_space<vmem>>, vector<32x128xbf16>
    %cst = arith.constant dense<0.000000e+00> : vector<8x128xf32>
    %5 = tpu.matmul %3, %4, %cst {dimension_numbers = #tpu.dot_dimension_numbers<[1], [0], [0], [1], [0, 0, 1, 1], [], []>} : vector<8x32xbf16>, vector<32x128xbf16>, vector<8x128xf32> -> vector<8x128xf32>
    %c0_4 = arith.constant 0 : index
    %c0_5 = arith.constant 0 : index
    %6 = vector.load %arg5[%c0_4, %c0_5] : memref<8x128xf32, #tpu.memory_space<vmem>>, vector<8x128xf32>
    tpu.vector_store %arg5[%c0_4, %c0_5], %5 {strides = array<i32>} : memref<8x128xf32, #tpu.memory_space<vmem>>, vector<8x128xf32>,
    %c2_i32 = arith.constant 2 : i32
    %7 = arith.muli %arg0, %c2_i32 : i32
    %8 = arith.addi %7, %arg1 : i32
    %c128_i32 = arith.constant 128 : i32
    %9 = arith.muli %8, %c128_i32 : i32
    %10 = tpu.iota {dimensions = array<i32: 1>} : vector<1x128xi32>
    %11 = vector.broadcast %9 : i32 to vector<1x128xi32>
    %12 = arith.addi %11, %10 : vector<1x128xi32>
    %c0_6 = arith.constant 0 : index
    %13 = memref.load %arg2[%c0_6] : memref<4xi32, #tpu.memory_space<smem>>
    %14 = vector.broadcast %13 : i32 to vector<1x128xi32>
    %15 = arith.cmpi eq, %12, %14 : vector<1x128xi32>
    %c1 = arith.constant 1 : index
    %16 = memref.load %arg2[%c1] : memref<4xi32, #tpu.memory_space<smem>>
    %17 = vector.broadcast %16 : i32 to vector<1x128xi32>
    %18 = arith.cmpi eq, %12, %17 : vector<1x128xi32>
    %19 = arith.ori %15, %18 : vector<1x128xi1>
    %c2 = arith.constant 2 : index
    %20 = memref.load %arg2[%c2] : memref<4xi32, #tpu.memory_space<smem>>
    %21 = vector.broadcast %20 : i32 to vector<1x128xi32>
    %22 = arith.cmpi eq, %12, %21 : vector<1x128xi32>
    %23 = arith.ori %19, %22 : vector<1x128xi1>
    %c3 = arith.constant 3 : index
    %24 = memref.load %arg2[%c3] : memref<4xi32, #tpu.memory_space<smem>>
    %25 = vector.broadcast %24 : i32 to vector<1x128xi32>
    %26 = arith.cmpi eq, %12, %25 : vector<1x128xi32>
    %27 = arith.ori %23, %26 : vector<1x128xi1>
    %cst_7 = arith.constant 0xFF800000 : f32
    %28 = vector.shape_cast %27 : vector<1x128xi1> to vector<1x128xi1>
    %29 = vector.broadcast %28 : vector<1x128xi1> to vector<8x128xi1>
    %30 = vector.broadcast %cst_7 : f32 to vector<8x128xf32>
    %31 = arith.select %29, %5, %30 : vector<8x128xi1>, vector<8x128xf32>
    %cst_8 = arith.constant dense<0xFF800000> : vector<8xf32>
    %32 = vector.multi_reduction <maximumf>, %31, %cst_8 [1] : vector<8x128xf32> to vector<8xf32>
    %33 = vector.shape_cast %32 : vector<8xf32> to vector<8x1xf32>
    %cst_9 = arith.constant dense<true> : vector<1x128xi1>
    %34 = arith.xori %27, %cst_9 : vector<1x128xi1>
    %c500_i32 = arith.constant 500 : i32
    %35 = vector.broadcast %c500_i32 : i32 to vector<1x128xi32>
    %36 = arith.cmpi slt, %12, %35 : vector<1x128xi32>
    %37 = arith.andi %34, %36 : vector<1x128xi1>
    %cst_10 = arith.constant 0xFF800000 : f32
    %38 = vector.shape_cast %37 : vector<1x128xi1> to vector<1x128xi1>
    %39 = vector.broadcast %38 : vector<1x128xi1> to vector<8x128xi1>
    %40 = vector.broadcast %cst_10 : f32 to vector<8x128xf32>
    %41 = arith.select %39, %5, %40 : vector<8x128xi1>, vector<8x128xf32>
    %cst_11 = arith.constant dense<0xFF800000> : vector<8xf32>
    %42 = vector.multi_reduction <maximumf>, %41, %cst_11 [1] : vector<8x128xf32> to vector<8xf32>
    %43 = vector.shape_cast %42 : vector<8xf32> to vector<8x1xf32>
    %c0_12 = arith.constant 0 : index
    %c0_13 = arith.constant 0 : index
    %44 = vector.load %arg8[%c0_12, %c0_13] : memref<8x1xf32, #tpu.memory_space<vmem>>, vector<8x1xf32>
    %45 = arith.maximumf %44, %33 : vector<8x1xf32>
    %c0_14 = arith.constant 0 : index
    %c0_15 = arith.constant 0 : index
    %46 = vector.load %arg8[%c0_14, %c0_15] : memref<8x1xf32, #tpu.memory_space<vmem>>, vector<8x1xf32>
    tpu.vector_store %arg8[%c0_14, %c0_15], %45 {strides = array<i32>} : memref<8x1xf32, #tpu.memory_space<vmem>>, vector<8x1xf32>,
    %c0_16 = arith.constant 0 : index
    %c0_17 = arith.constant 0 : index
    %47 = vector.load %arg9[%c0_16, %c0_17] : memref<8x1xf32, #tpu.memory_space<vmem>>, vector<8x1xf32>
    %48 = arith.maximumf %47, %43 : vector<8x1xf32>
    %c0_18 = arith.constant 0 : index
    %c0_19 = arith.constant 0 : index
    %49 = vector.load %arg9[%c0_18, %c0_19] : memref<8x1xf32, #tpu.memory_space<vmem>>, vector<8x1xf32>
    tpu.vector_store %arg9[%c0_18, %c0_19], %48 {strides = array<i32>} : memref<8x1xf32, #tpu.memory_space<vmem>>, vector<8x1xf32>,
    %c1_i32 = arith.constant 1 : i32
    %50 = arith.cmpi eq, %arg1, %c1_i32 : i32
    %51 = arith.extui %50 : i1 to i32
    %c0_i32_20 = arith.constant 0 : i32
    %52 = arith.cmpi ne, %51, %c0_i32_20 : i32
    scf.if %52 {
      %c0_21 = arith.constant 0 : index
      %c0_22 = arith.constant 0 : index
      %53 = vector.load %arg8[%c0_21, %c0_22] : memref<8x1xf32, #tpu.memory_space<vmem>>, vector<8x1xf32>
      %c0_23 = arith.constant 0 : index
      %c0_24 = arith.constant 0 : index
      %c0_25 = arith.constant 0 : index
      %54 = vector.load %arg6[%c0_23, %c0_24, %c0_25] : memref<1x8x1xf32, #tpu.memory_space<vmem>>, vector<1x8x1xf32>
      %55 = vector.shape_cast %54 : vector<1x8x1xf32> to vector<8x1xf32>
      %56 = vector.shape_cast %53 : vector<8x1xf32> to vector<1x8x1xf32>
      tpu.vector_store %arg6[%c0_23, %c0_24, %c0_25], %56 {strides = array<i32>} : memref<1x8x1xf32, #tpu.memory_space<vmem>>, vector<1x8x1xf32>,
      %c0_26 = arith.constant 0 : index
      %c0_27 = arith.constant 0 : index
      %57 = vector.load %arg9[%c0_26, %c0_27] : memref<8x1xf32, #tpu.memory_space<vmem>>, vector<8x1xf32>
      %c0_28 = arith.constant 0 : index
      %c0_29 = arith.constant 0 : index
      %c0_30 = arith.constant 0 : index
      %58 = vector.load %arg7[%c0_28, %c0_29, %c0_30] : memref<1x8x1xf32, #tpu.memory_space<vmem>>, vector<1x8x1xf32>
      %59 = vector.shape_cast %58 : vector<1x8x1xf32> to vector<8x1xf32>
      %60 = vector.shape_cast %57 : vector<8x1xf32> to vector<1x8x1xf32>
      tpu.vector_store %arg7[%c0_28, %c0_29, %c0_30], %60 {strides = array<i32>} : memref<1x8x1xf32, #tpu.memory_space<vmem>>, vector<1x8x1xf32>,
    } else {
    }
    return
  }
  func.func @transform_0(%arg0: i32, %arg1: i32, %arg2: memref<4xi32, #tpu.memory_space<smem>>) -> (i32, i32) {
    %c0_i32 = arith.constant 0 : i32
    %c0_i32_0 = arith.constant 0 : i32
    %c0_i32_1 = arith.constant 0 : i32
    return %c0_i32, %c0_i32_0 : i32, i32
  }
  func.func @transform_1(%arg0: i32, %arg1: i32, %arg2: memref<4xi32, #tpu.memory_space<smem>>) -> (i32, i32) {
    %c2_i32 = arith.constant 2 : i32
    %0 = arith.muli %arg0, %c2_i32 : i32
    %1 = arith.addi %0, %arg1 : i32
    %c0_i32 = arith.constant 0 : i32
    %c0_i32_0 = arith.constant 0 : i32
    return %c0_i32, %1 : i32, i32
  }
  func.func @transform_2(%arg0: i32, %arg1: i32, %arg2: memref<4xi32, #tpu.memory_space<smem>>) -> (i32, i32) {
    %c2_i32 = arith.constant 2 : i32
    %0 = arith.muli %arg0, %c2_i32 : i32
    %1 = arith.addi %0, %arg1 : i32
    %c0_i32 = arith.constant 0 : i32
    %c0_i32_0 = arith.constant 0 : i32
    return %c0_i32, %1 : i32, i32
  }
  func.func @transform_3(%arg0: i32, %arg1: i32, %arg2: memref<4xi32, #tpu.memory_space<smem>>) -> (i32, i32, i32) {
    %c0_i32 = arith.constant 0 : i32
    %c0_i32_0 = arith.constant 0 : i32
    %c0_i32_1 = arith.constant 0 : i32
    return %arg0, %c0_i32, %c0_i32_0 : i32, i32, i32
  }
  func.func @transform_4(%arg0: i32, %arg1: i32, %arg2: memref<4xi32, #tpu.memory_space<smem>>) -> (i32, i32, i32) {
    %c0_i32 = arith.constant 0 : i32
    %c0_i32_0 = arith.constant 0 : i32
    %c0_i32_1 = arith.constant 0 : i32
    return %arg0, %c0_i32, %c0_i32_0 : i32, i32, i32
  }
}

</mosaic_0001>

<bundles_post_ra>
// kernel: tpu_custom_call.1
= control target key start
LH: loop header
LB: loop body
LE: loop exit
PB: predicated region body
PF: predicated region fallthrough
CT: control target
= control target key end

     0   :  { %s1208_s0 = inlined_call_operand.hbm [shape: s32[4], index: 0, kind: input, shape index: {}]   ;;  %s1209_s1 = inlined_call_operand.hbm [shape: bf16[8,32], index: 1, kind: input, shape index: {}]   ;;  %s1210_s2 = inlined_call_operand.hbm [shape: bf16[32,512], index: 2, kind: input, shape index: {}]   ;;  %s1211_s3 = inlined_call_operand.hbm [shape: f32[8,512], index: 3, kind: output, shape index: {0}]   ;;  %s1212_s4 = inlined_call_operand.vmem [shape: f32[2,8,1], index: 4, kind: output, shape index: {1}]   ;;  %s1213_s5 = inlined_call_operand.vmem [shape: f32[2,8,1], index: 5, kind: output, shape index: {2}]  }
   0x1   :  { %1223 = sst [smem:[#allocation19_spill]] %s1209_s1  ;;  %s719_s20 = scalar_lea.hbm %s1208_s0, 16 }
   0x2   :  { %p720_p0 = scmp.ne.s32.totalorder %s1208_s0, %s719_s20  ;;  %p723_p1 = scmp.lt.u32.totalorder %s719_s20, %s1208_s0 }
   0x4   :  { %p725_p2 = pnand %p723_p1, %p720_p0 }
   0x6   :  { %728 = shalt.err (!%p725_p2)  }
   0x7   :  { %s893_s25 = smov [#allocation5]  }
   0x8   :  { %12 = dma.hbm_to_smem %s1208_s0, 16, %s893_s25, [#allocation4] }
   0x9   :  { %847 = dma.done.wait [#allocation4], 16 }
   0xa   :  { %848 = vsyncadd [#allocation4], 4294967280 }
   0xb   :  { %14 = sfence }
   0xc   :  { %15 = vsyncpa [#allocation7], 0 }
   0xd   :  { %16 = vsyncpa [#allocation10], 0 }
   0xe   :  { %18 = vsyncpa [#allocation10 + $0x1], 0 }
   0xf   :  { %19 = vsyncpa [#allocation8], 0 }
  0x10   :  { %21 = vsyncpa [#allocation8 + $0x1], 0  ;;  %s947_s28 = smov 0   ;;  %s949_s29 = smov 0  }
  0x11   :  { %s951_s30 = smov 0   ;;  %s953_s6 = smov 0  }
  0x12   :  { %s955_s7 = smov 0   ;;  %s957_s8 = smov 0  }
  0x13   :  { %s959_s0 = smov 0   ;;  %s961_s9 = smov 0  }
  0x14 LB: > { %1224 = sst [smem:[#allocation16_spill]] %s883_s8  ;;  %s575_s10 = sadd.s32 4294967295, %s891_s9   ;;  %s891_s9 = sphi %s961_s9, %s27_s9   ;;  %s887_s0 = sphi %s959_s0, %s1251_s0   ;;  %s883_s8 = sphi %s957_s8, %s1250_s8   ;;  %s879_s7 = sphi %s955_s7, %s1246_s7   ;;  %s875_s6 = sphi %s953_s6, %s1245_s6   ;;  %s871_s30 = sphi %s951_s30, %s1249_s30   ;;  %s867_s29 = sphi %s949_s29, %s1248_s29   ;;  %s863_s28 = sphi %s947_s28, %s1247_s28  }
  0x15   : > { %1225 = sst [smem:[#allocation17_spill]] %s887_s0  ;;  %s576_s11 = sadd.s32 4294967294, %s891_s9  }
  0x16   : > { %p78_p3 = scmp.ne.s32.totalorder %s871_s30, %s867_s29  ;;  %p79_p4 = scmp.eq.s32.totalorder %s891_s9, 0 }
  0x17   : > { %p84_p5 = scmp.ne.s32.totalorder %s867_s29, %s863_s28  ;;  %p995_p6 = scmp.eq.s32.totalorder %s575_s10, 0 }
  0x18   : > { %p112_p7 = scmp.eq.s32.totalorder %s575_s10, 3  ;;  %p999_p8 = por %p79_p4, %p78_p3 }
  0x19   : > { %s1226_s13 = scalar_select %p995_p6, 1, 0 }
  0x1a   : > { %p118_p9 = scmp.eq.s32.totalorder %s576_s11, 3  ;;  %p1005_p10 = por %p995_p6, %p84_p5 }
  0x1b   : > { %p1009_p11 = por %p112_p7, %p78_p3  ;;  %p581_p13 = scmp.ge.s32.totalorder %s891_s9, 1 }
  0x1c   : > { %s1228_s15 = scalar_select %p1005_p10, 1, 0 }
  0x1d   : > { %s1229_s16 = scalar_select %p1009_p11, 1, 0 }
  0x1e   : > { %p1013_p12 = por %p118_p9, %p84_p5  ;;  %p177_p0 = scmp.lt.s32.totalorder %s891_s9, 5 }
  0x1f   : > { %s894_s19 = smov [#allocation6]   ;;  %p640_p2 = scmp.lt.s32.totalorder %s891_s9, 4 }
  0x20   : > { %s1230_s17 = scalar_select %p1013_p12, 1, 0 }
  0x21   : > { %p1019_p1 = pnand %p581_p13, %p177_p0  ;;  %s190_s20 = sshll.u32 %s894_s19, 4  ;;  %s191_s20 = int_to_ptr.vmem [resolvable:$true] %s190_s20 }
  0x22   : > { %1231 = sst [smem:[#allocation18_spill]] %s1230_s17  ;;  %p1028_p4 = pnand %p640_p2, %p999_p8 }
  0x23   : > { %s1232_s18 = scalar_select %p1019_p1, 1, 0 }
  0x24   : > { %p627_p3 = pneg %p1019_p1  ;;  %s36_s23 = sadd.s32 1, %s883_s8 }
  0x25   : > { %s1233_s21 = scalar_select %p1028_p4, 1, 0 }
  0x26   : > { %p1034_p5 = pnand %p627_p3, %p995_p6  ;;  %s1235_s1 = sld [smem:[#allocation19_spill]] }
  0x28   : > { %p731_p8 = pneg %p1034_p5 }
  0x2c   : > { %s729_s26 = scalar_lea.hbm %s1235_s1, 64 }
  0x2d   : > { %p730_p7 = scmp.ne.s32.totalorder %s1235_s1, %s729_s26  ;;  %p736_p0 = scmp.lt.u32.totalorder %s729_s26, %s1235_s1 }
  0x2f   : > { %p732_p9 = pnand %p731_p8, %p730_p7 }
  0x31   : > { %p733_p13 = pneg %p732_p9 }
  0x33   : > { %p738_p2 = pnand %p736_p0, %p733_p13 }
  0x35   : > { %741 = shalt.err (!%p738_p2)
}
  0x36   : > { %s742_s19 = scalar_lea.vmem %s191_s20, 64  ;;  %p750_p10 = scmp.lt.s32.totalorder %s191_s20, %s191_s20 }
  0x37   : > { %p743_p3 = scmp.ne.s32.totalorder %s191_s20, %s742_s19  ;;  %p751_p6 = scmp.lt.s32.totalorder %s742_s19, %s742_s19 }
  0x39   : > { %p745_p12 = pnand %p743_p3, %p731_p8  ;;  %p752_p1 = por %p751_p6, %p750_p10 }
  0x3b   : > { %p746_p11 = pneg %p745_p12 }
  0x3d   : > { %p753_p4 = pnand %p752_p1, %p746_p11 }
  0x3f   : > { %756 = shalt.err (!%p753_p4)
}
  0x40   : > { %630 = dma.hbm_to_vmem [thread:$0]  (!%p1034_p5), %s1235_s1, 64, %s191_s20, [#allocation7]  }
  0x41   : > { %p37_p7 = scmp.ge.s32.totalorder %s36_s23, 2  ;;  %s39_s26 = sadd.s32 1, %s887_s0 }
  0x42   : > { %s577_s27 = sshll.u32 %s887_s0, 1  ;;  %s201_s10 = sand.u32 1, %s871_s30  }
  0x43   : > { %s1253_s23 = smov (%p37_p7, %s36_s23), 0  ;;  %s1255_s26 = smov (!%p37_p7, %s39_s26), %s887_s0 }
  0x44   : > { %s65_s11 = sadd.s32 %s883_s8, %s577_s27  ;;  %p41_p6 = scmp.ge.s32.totalorder %s1255_s26, 2 }
  0x45   : > { %s584_s22 = sshll.u32 %s201_s10, 4  ;;  %s586_s14 = sshll.u32 %s65_s11, 6 }
  0x46   : > { %s1257_s26 = smov (%p41_p6, %s1255_s26), 0  ;;  %s1067_s20 = scalar_lea.hbm %s1210_s2, %s586_s14 }
  0x47   : > { %s205_s25 = scalar_lea.vmem [#allocation9], %s584_s22  ;;  %s578_s27 = sshll.u32 %s1257_s26, 1 }
  0x48   : > { %s213_s12 = sshll.u32 %s205_s25, 4  ;;  %s67_s1 = sadd.s32 %s578_s27, %s1253_s23  ;;  %s1070_s12 = int_to_ptr.vmem [resolvable:$true] %s213_s12 }
  0x49   : > { %s68_s0 = ssub.s32 %s65_s11, %s67_s1  ;;  %s1077_s17 = scalar_lea.sflag [#allocation10], %s201_s10 }
  0x4a   : > { %p1073_p10 = scmp.eq.s32.totalorder %s68_s0, 0  ;;  %s757_s19 = scalar_lea.hbm %s1067_s20, 256 }
  0x4b   : > { %p758_p11 = scmp.ne.s32.totalorder %s1067_s20, %s757_s19  ;;  %p1237_p12 = scmp.ne.s32.totalorder %s1233_s21, 0 }
  0x4c   : > { %s762_s24 = scalar_lea.hbm %s1210_s2, 1024  ;;  %p763_p8 = scmp.lt.u32.totalorder %s1067_s20, %s1210_s2 }
  0x4d   : > { %p759_p1 = pneg %p1237_p12  ;;  %p764_p9 = scmp.lt.u32.totalorder %s762_s24, %s757_s19 }
  0x4e   : > { %p766_p0 = scmp.lt.u32.totalorder %s757_s19, %s1067_s20 }
  0x4f   : > { %p760_p4 = pnand %p759_p1, %p758_p11  ;;  %p765_p13 = por %p764_p9, %p763_p8 }
  0x51   : > { %p761_p5 = pneg %p760_p4  ;;  %p767_p2 = por %p766_p0, %p765_p13 }
  0x53   : > { %p768_p3 = pnand %p767_p2, %p761_p5 }
  0x55   : > { %771 = shalt.err (!%p768_p3)
}
  0x56   : > { %s772_s0 = scalar_lea.vmem %s1070_s12, 256  ;;  %s895_s10 = smov [#allocation9]  }
  0x57   : > { %p773_p7 = scmp.ne.s32.totalorder %s1070_s12, %s772_s0  ;;  %s777_s11 = sshll.u32 %s895_s10, 4  ;;  %s778_s11 = int_to_ptr.vmem [resolvable:$false] %s777_s11 }
  0x58   : > { %s779_s27 = scalar_lea.vmem %s778_s11, 512  ;;  %p780_p4 = scmp.lt.s32.totalorder %s1070_s12, %s778_s11 }
  0x59   : > { %p775_p6 = pnand %p773_p7, %p759_p1  ;;  %p781_p8 = scmp.lt.s32.totalorder %s779_s27, %s772_s0 }
  0x5b   : > { %p776_p11 = pneg %p775_p6  ;;  %p782_p9 = por %p781_p8, %p780_p4 }
  0x5d   : > { %p783_p13 = pnand %p782_p9, %p776_p11 }
  0x5f   : > { %786 = shalt.err (!%p783_p13)
}
  0x60   : > { %s896_s19 = smov 256   ;;  %s897_s22 = smov 64  }
  0x61   : > { %s898_s14 = smov 4   ;;  %s1238_s24 = sadd.s32 1, %s871_s30 }
  0x62   : > { %634 = dma.hbm_to_vmem [thread:$0]  (!%p1237_p12), %s1067_s20, 256, %s1070_s12, %s1077_s17, %s896_s19, %s897_s22, %s898_s14  }
  0x63   : > { %s1110_s25 = scalar_select %p1073_p10, %s871_s30, %s1238_s24  }
  0x64   : > { %p1239_p1 = scmp.ne.s32.totalorder %s1232_s18, 0 }
  0x65   : > { %p1240_p5 = scmp.ne.s32.totalorder (!%p1239_p1), %s1226_s13, 0 }
  0x66   : > { %225 = sbr.rel (%p1239_p1) target bundleno = 528 (0x210), region = 28 }
  0x6d   : > { %850 = dma.done.wait (%p1240_p5), [#allocation7], 64  }
  0x6e   : > { %852 = vsyncadd (%p1240_p5), [#allocation7], 4294967232  ;;  %s1119_s1 = sand.u32 1, %s867_s29   ;;  %p1241_p10 = scmp.ne.s32.totalorder %s1228_s15, 0 }
  0x6f   : > { %s589_s12 = sshll.u32 %s1119_s1, 4  ;;  %s232_s17 = scalar_lea.sflag [#allocation10], %s1119_s1 }
  0x70   : > { %s235_s8 = scalar_lea.vmem [#allocation9], %s589_s12 }
  0x71   : > { %854 = dma.done.wait (%p1241_p10), %s232_s17, 256  }
  0x72   : > { %856 = vsyncadd (%p1241_p10), %s232_s17, 4294967040  ;;  %s590_s18 = sshll.u32 %s1119_s1, 3  ;;  %p272_p12 = scmp.lt.s32.totalorder %s879_s7, 1 }
  0x73   : > { %s1140_s22 = scalar_lea.vmem [#allocation11], %s590_s18  ;;  %p593_p0 = scmp.ne.s32.totalorder %s875_s6, 0 }
  0x74   : > { %s273_s13 = scalar_select %p272_p12, %s879_s7, 1 }
  0x75   : > { %284 = sbr.rel (%p593_p0) target bundleno = 124 (0x7c), region = 40  ;;  %vm285_vm0 = vcmask (!%p593_p0), 7168   ;;  %v899_v0 = vmov (!%p593_p0), -inf  }
  0x76   : > { %s591_s21 = sshll.u32 %s273_s13, 3  ;;  %286 = vst.msk [vmem:[#allocation2] sm:$0xff] (!%p593_p0), %vm285_vm0, %v899_v0  ;;  %287 = vst.msk [vmem:[#allocation3] sm:$0xff] (!%p593_p0), %vm285_vm0, %v899_v0 }
  0x77   : > { %s1133_s10 = scalar_lea.vmem %s1212_s4, %s591_s21  ;;  %s1138_s19 = scalar_lea.vmem %s1213_s5, %s591_s21 }
  0x7c PF: > { %v717_v1 = vld [vmem:[%s235_s8] sm:$0xff]   ;;  %v900_v2 = vmov 0.0   ;;  %v718_v3 = vld [vmem:[%s235_s8 + $0x8] sm:$0xff]   ;;  %vm901_vm1 = vmmov 0   ;;  %vm305_vm2 = vcmask 261120   ;;  %s597_s15 = sshll.u32 %s879_s7, 1  ;;  %v353_v5 = vlaneseq }
  0x7d   : > { %611 = vmatprep.subr.bf16.mxu0 %v900_v2  ;;  %615 = vmatprep.mubr.msk.bf16.mxu0 %vm901_vm1, %v900_v2  ;;  %v288_v4 = vld [vmem:[#allocation6] sm:$0xf]  ;;  %s1145_s14 = sadd.s32 %s875_s6, %s597_s15  ;;  %s357_s24 = sld [smem:[#allocation5]]  ;;  %vm902_vm10 = vmmov 1   ;;  %v903_v13 = vmov 0   ;;  %v385_v21 = vld [vmem:[#allocation2] sm:$0xff] }
  0x7e   : > { %612 = vmatpush3.bf16.msra.mxu0 %v717_v1  ;;  %s599_s12 = sld [smem:[#allocation5 + $0x1]]  ;;  %s598_s17 = sshll.u32 %s1145_s14, 7  ;;  %v354_v6 = vand.u32 127, %v353_v5  ;;  %vm387_vm15 = vcmask 7168   ;;  %v389_v24 = vld [vmem:[#allocation3] sm:$0xff] }
  0x7f   : > { %613 = vmatprep.subr.bf16.mxu0 %v900_v2  ;;  %s600_s18 = sld [smem:[#allocation5 + $0x2]]  ;;  %v355_v7 = vstv %s598_s17  ;;  %s601_s8 = sld [smem:[#allocation5 + $0x3]] }
  0x80   : > { %v356_v8 = vadd.s32 %v355_v7, %v354_v6  ;;  %p602_p2 = scmp.ne.s32.totalorder %s875_s6, 1 }
  0x82   : > { %614 = vmatpush3.bf16.msra.mxu0 %v718_v3  ;;  %vm378_vm12 = vcmp.lt.s32.totalorder %v356_v8, 500 }
  0x83   : > { %v358_v9 = vstv %s357_s24 }
  0x84   : > { %v361_v10 = vstv %s599_s12  ;;  %vm359_vm3 = vcmp.eq.s32.totalorder %v356_v8, %v358_v9 }
  0x85   : > { %616 = vmatmul.mubr.msk.bf16.vlgmr.msra.gmra.mrb[0].mxu0 %vm305_vm2, %v288_v4  ;;  %vm362_vm4 = vcmp.eq.s32.totalorder %v356_v8, %v361_v10  ;;  %v365_v11 = vstv %s600_s18  ;;  %v369_v12 = vstv %s601_s8 }
  0x86   : > { %vm363_vm5 = vmor %vm359_vm3, %vm362_vm4  ;;  %vm366_vm6 = vcmp.eq.s32.totalorder %v356_v8, %v365_v11  ;;  %vm370_vm8 = vcmp.eq.s32.totalorder %v356_v8, %v369_v12 }
  0x87   : > { %vm367_vm7 = vmor %vm363_vm5, %vm366_vm6 }
  0x88   : > { %vm371_vm9 = vmor %vm367_vm7, %vm370_vm8 }
  0x89   : > { %vm377_vm11 = vmxor %vm371_vm9, %vm902_vm10 }
  0x8a   : > { %vm379_vm13 = vmand %vm377_vm11, %vm378_vm12 }
  0x8b   : > { %v380_v14 = vsel %vm379_vm13, 1, %v903_v13 }
  0x8c   : > { %vm381_vm14 = vcmp.eq.s32.totalorder %v380_v14, 1 }
 0x158   : > { %v343_v15 = vpop.f32.mrb[0].mxu0 }
 0x159   : > { %349 = vst [vmem:[%s1140_s22] sm:$0xff] %v343_v15  ;;  %v617_v16 = vpop.f32.mrb[1].mxu0  ;;  %v374_v17 = vsel %vm371_vm9, %v343_v15, -inf  ;;  %v382_v20 = vsel %vm381_vm14, %v343_v15, -inf }
 0x15a   : > { %375 = vmax.xlane.f32.xlu0 %v374_v17  ;;  %v346_v18 = vpop.f32.mrb[2].mxu0 }
 0x15b   : > { %v618_v19 = vpop.f32.mrb[3].mxu0 }
 0x15e   : > { %383 = vmax.xlane.f32.xlu0 %v382_v20 }
 0x1e7   : > { %v376_v22 = vpop.xlane.xlu0 %375 }
 0x1e8   : > { %v386_v23 = vmax.f32 %v385_v21, %v376_v22  ;;  %395 = sbr.rel (%p602_p2) target bundleno = 503 (0x1f7), region = 44 }
 0x1ea   : > { %388 = vst.msk [vmem:[#allocation2] sm:$0xff] %vm387_vm15, %v386_v23 }
 0x1eb   : > { %v384_v25 = vpop.xlane.xlu0 %383 }
 0x1ec   : > { %v390_v26 = vmax.f32 %v389_v24, %v384_v25 }
 0x1ee   : > { %391 = vst.msk [vmem:[#allocation3] sm:$0xff] %vm387_vm15, %v390_v26 }
 0x1f1   : > { %v396_v27 = vld [vmem:[#allocation2] sm:$0xff] }
 0x1f2   : > { %397 = vst.msk [vmem:[%s1133_s10] sm:$0xff] %vm387_vm15, %v396_v27 }
 0x1f5   : > { %v398_v28 = vld [vmem:[#allocation3] sm:$0xff] }
 0x1f6   : > { %399 = vst.msk [vmem:[%s1138_s19] sm:$0xff] %vm387_vm15, %v398_v28 }
 0x1f7 PF: > { %s1159_s21 = scalar_lea.hbm %s1211_s3, %s598_s17  ;;  %s424_s20 = sshll.u32 %s1140_s22, 4  ;;  %s425_s20 = int_to_ptr.vmem [resolvable:$true] %s424_s20 }
 0x1f8   : > { %s401_s6 = scalar_lea.sflag [#allocation8], %s1119_s1  ;;  %s787_s0 = scalar_lea.vmem %s425_s20, 128 }
 0x1f9   : > { %p788_p3 = scmp.ne.s32.totalorder %s425_s20, %s787_s0  ;;  %p1242_p7 = scmp.ne.s32.totalorder %s1229_s16, 0 }
 0x1fa   : > { %s904_s10 = smov [#allocation11]  }
 0x1fb   : > { %p789_p6 = pnand %p788_p3, %p1242_p7  ;;  %s791_s11 = sshll.u32 %s904_s10, 4  ;;  %s792_s11 = int_to_ptr.vmem [resolvable:$false] %s791_s11 }
 0x1fc   : > { %s793_s27 = scalar_lea.vmem %s792_s11, 256  ;;  %p794_p4 = scmp.lt.s32.totalorder %s425_s20, %s792_s11 }
 0x1fd   : > { %p790_p11 = pneg %p789_p6  ;;  %p795_p8 = scmp.lt.s32.totalorder %s793_s27, %s787_s0 }
 0x1ff   : > { %p796_p9 = por %p795_p8, %p794_p4 }
 0x201   : > { %p797_p13 = pnand %p796_p9, %p790_p11 }
 0x203   : > { %800 = shalt.err (!%p797_p13)
}
 0x204   : > { %s801_s1 = scalar_lea.hbm %s1159_s21, 128  ;;  %s805_s15 = scalar_lea.hbm %s1211_s3, 512 }
 0x205   : > { %p802_p1 = scmp.ne.s32.totalorder %s1159_s21, %s801_s1  ;;  %p806_p12 = scmp.lt.u32.totalorder %s1159_s21, %s1211_s3 }
 0x206   : > { %p807_p0 = scmp.lt.u32.totalorder %s805_s15, %s801_s1  ;;  %p809_p3 = scmp.lt.u32.totalorder %s801_s1, %s1159_s21 }
 0x207   : > { %p803_p5 = pnand %p802_p1, %p1242_p7 }
 0x208   : > { %p808_p2 = por %p807_p0, %p806_p12 }
 0x209   : > { %p804_p10 = pneg %p803_p5 }
 0x20a   : > { %p810_p6 = por %p809_p3, %p808_p2 }
 0x20c   : > { %p811_p11 = pnand %p810_p6, %p804_p10 }
 0x20e   : > { %814 = shalt.err (!%p811_p11)
}
 0x20f   : > { %625 = dma.vmem_to_hbm [thread:$0]  (%p1242_p7), %s425_s20, 128, %s1159_s21, %s401_s6  }
 0x210 PF: > { %s1243_s12 = sld [smem:[#allocation18_spill]]  ;;  %p642_p4 = scmp.ge.s32.totalorder %s891_s9, 2 }
 0x211   : > { %s442_s17 = sand.u32 1, %s863_s28  }
 0x212   : > { %s443_s18 = scalar_lea.sflag [#allocation8], %s442_s17 }
 0x216   : > { %p1244_p8 = scmp.ne.s32.totalorder %s1243_s12, 0 }
 0x218   : > { %p636_p9 = pnand %p642_p4, %p1244_p8 }
 0x21a   : > { %858 = dma.done.wait (!%p636_p9), %s443_s18, 128  }
 0x21b   : > { %860 = vsyncadd (!%p636_p9), %s443_s18, 4294967168  ;;  %s27_s9 = sadd.s32 1, %s891_s9   ;;  %s1245_s6 = sld [smem:[#allocation16_spill]] }
 0x21c   : > { %p24_p13 = scmp.ge.s32.totalorder %s27_s9, 6   ;;  %s1246_s7 = sld [smem:[#allocation17_spill]] }
 0x21d   : > { %s1247_s28 = smov %s867_s29  ;;  %s1248_s29 = smov %s871_s30 }
 0x21e   : > { %s1249_s30 = smov %s1110_s25  ;;  %s1250_s8 = smov %s1253_s23 }
 0x21f   : > { %s1251_s0 = smov %s1257_s26  ;;  %26 = sbr.rel (!%p24_p13) target bundleno = 20 (0x14), region = 110 }
 0x226   :  { %462 = vsyncpa [#allocation7], 1 }
 0x227   :  { %464 = vsyncpa [#allocation7 + $0x1], 1 }
 0x228   :  { %465 = vsyncpa [#allocation10], 1 }
 0x229   :  { %467 = vsyncpa [#allocation10 + $0x1], 1 }
 0x22a   :  { %468 = vsyncpa [#allocation8], 1 }
 0x22b   :  { %470 = vsyncpa [#allocation8 + $0x1], 1 }

</bundles_post_ra>
